<compile_context>
chip_gen: v7x
topology: tpu7x:2x2x1
jax: 0.10.0
libtpu: 0.0.40
codegen_flags: <defaults>
</compile_context>

<pallas_src>
import jax
import jax.numpy as jnp
from jax.experimental import pallas as pl
from jax.experimental.pallas import tpu as pltpu


_LANE_CANDIDATES = (4096, 2048, 1024, 512, 256, 128)
_SUBLANE = 8


def _cdiv(a, b):
    return -(-a // b)


def _round_up(a, m):
    return _cdiv(a, m) * m


def _choose_lanes(num_elems):
    """Largest lane width (multiple of 128) that evenly divides num_elems."""
    for lanes in _LANE_CANDIDATES:
        if num_elems % lanes == 0:
            return lanes
    return None


def _plan_tensor(x):
    """Lane-dense 2-D view plan for one tensor."""
    n = int(x.size)
    lanes = _choose_lanes(n)
    padded_n = n
    if lanes is None:
        # Element count not a multiple of 128: pad the flat view up to a
        # multiple of 8*128 so the slab is still lane-dense.  The pad/slice
        # around the kernel is extra XLA traffic, but it only triggers for
        # awkward shapes and keeps the semantics consistent (every tensor is
        # really copied when use_pallas_copy=True).
        padded_n = _round_up(n, _SUBLANE * 128)
        lanes = _choose_lanes(padded_n)
    rows = padded_n // lanes
    return {
        "n": n,
        "padded_n": padded_n,
        "lanes": lanes,
        "rows": rows,
        "bytes_per_row": lanes * x.dtype.itemsize,
        "shape": x.shape,
        "dtype": x.dtype,
    }


def _fused_copy_kernel(*refs):
    # Elementwise identity: move each tile through VMEM unchanged.  Tensors
    # whose tile count is smaller than the grid keep a clamped (unchanged)
    # block index on the trailing steps, so re-running the copy there is pure
    # VMEM traffic and writes back identical data — safe on a single
    # TensorCore and under v7x megacore sharding.
    k = len(refs) // 2
    for x_ref, o_ref in zip(refs[:k], refs[k:]):
        o_ref[...] = x_ref[...]


def pallas_identity_copy(tensors, *, tile_bytes=2 << 20):
    """Materialize fresh copies of `tensors` via ONE fused Pallas kernel."""
    tensors = list(tensors)
    plans = [_plan_tensor(x) for x in tensors]

    # Provisional number of grid steps: enough that every per-tensor tile
    # stays under `tile_bytes`; at least 2 steps when any tensor can be split
    # into two 8-sublane-aligned tiles (lets v7x shard the "parallel" axis
    # across its two TensorCores; one extra tiny step is noise on v5e/v6e).
    g = 1
    for p in plans:
        max_rows = max(_SUBLANE,
                       (tile_bytes // p["bytes_per_row"]) // _SUBLANE * _SUBLANE)
        p["max_rows"] = max_rows
        g = max(g, _cdiv(p["rows"], max_rows))
    if g == 1 and any(p["rows"] >= 2 * _SUBLANE for p in plans):
        g = 2

    # Balanced per-tensor row tiles: multiple of 8 (or full extent), sized so
    # every tensor finishes in ~g steps.  Ragged row counts are handled by a
    # cdiv grid (Pallas masks the boundary block) — no full-extent fallback.
    for p in plans:
        rows = p["rows"]
        if rows <= _SUBLANE:
            tile = rows                           # full extent (always legal)
        else:
            tile = _round_up(_cdiv(rows, g), _SUBLANE)
            tile = min(tile, p["max_rows"])
            if tile >= rows:
                tile = rows                       # full extent
        p["row_tile"] = tile
        p["tiles"] = _cdiv(rows, tile)

    grid_len = max(p["tiles"] for p in plans)

    in_specs = []
    out_specs = []
    out_shapes = []
    views = []
    for x, p in zip(tensors, plans):
        flat = x.reshape(-1)
        if p["padded_n"] != p["n"]:
            flat = jnp.pad(flat, (0, p["padded_n"] - p["n"]))
        views.append(flat.reshape(p["rows"], p["lanes"]))

        # Tensors with fewer tiles than the grid clamp their block index so
        # the trailing steps neither re-fetch nor re-write HBM.
        def idx_map(i, _nt=p["tiles"]):
            return (jnp.minimum(i, _nt - 1), 0)

        blk = (p["row_tile"], p["lanes"])
        in_specs.append(pl.BlockSpec(blk, idx_map))
        out_specs.append(pl.BlockSpec(blk, idx_map))
        out_shapes.append(jax.ShapeDtypeStruct((p["rows"], p["lanes"]),
                                               p["dtype"]))

    # Double-buffered working set: 2 input + 2 output buffers per tensor.
    per_step_bytes = sum(p["row_tile"] * p["bytes_per_row"] for p in plans)
    vmem_need = 4 * per_step_bytes + (4 << 20)          # + headroom
    vmem_limit = int(min(max(vmem_need, 16 << 20), 48 << 20))

    outs = pl.pallas_call(
        _fused_copy_kernel,
        out_shape=tuple(out_shapes),
        grid_spec=pltpu.PrefetchScalarGridSpec(
            num_scalar_prefetch=0,
            grid=(grid_len,),
            in_specs=in_specs,
            out_specs=tuple(out_specs),
        ),
        compiler_params=pltpu.CompilerParams(
            dimension_semantics=("parallel",),
            vmem_limit_bytes=vmem_limit,
        ),
        # NOTE: no input_output_aliases — use_pallas_copy exists to produce
        # genuinely fresh output buffers, so the inputs are not donated.
    )(*views)

    results = []
    for p, o in zip(plans, outs):
        flat = o.reshape(-1)
        if p["padded_n"] != p["n"]:
            flat = flat[: p["n"]]
        results.append(flat.reshape(p["shape"]))
    return results


def volume_encoder_forward(samples, encoder_states=None, context=None,
                           *, use_pallas_copy=False):
    """JAX equivalent of fairnr VolumeEncoder.forward.

    Default (use_pallas_copy=False): pure pass-through — no kernel, no HBM
    traffic.  This exactly matches the PyTorch semantics and is the
    recommended configuration (the optimum for an identity op).

    use_pallas_copy=True: all three tensors are copied into FRESH buffers by
    a single fused Pallas launch (only for callers that require materialized,
    distinct outputs).
    """
    del encoder_states  # unused by the PyTorch module as well
    pos = samples['sampled_point_xyz']
    ray = samples['sampled_point_ray_direction']
    dists = samples['sampled_point_distance']

    if use_pallas_copy:
        pos, ray, dists = pallas_identity_copy([pos, ray, dists])

    out = {'pos': pos, 'ray': ray, 'dists': dists}
    if context is not None:
        out['context'] = context
    return out


if __name__ == "__main__":
    key = jax.random.PRNGKey(0)
    k1, k2, k3 = jax.random.split(key, 3)

    # Small shapes consistent with fairnr's sampling convention:
    #   S (scenes)=2, V*P (rays)=64, K (samples/ray)=8, coord dim=3
    S, N, K, C = 2, 64, 8, 3
    samples = {
        'sampled_point_xyz':
            jax.random.normal(k1, (S, N, K, C), dtype=jnp.float32),
        'sampled_point_ray_direction':
            jax.random.normal(k2, (S, N, K, C), dtype=jnp.float32),
        'sampled_point_distance':
            jax.random.uniform(k3, (S, N, K), dtype=jnp.float32),
    }

    # Recommended path: zero-copy pass-through (no kernel launched).
    out_fast = volume_encoder_forward(samples)
    assert out_fast['pos'] is samples['sampled_point_xyz']
    assert out_fast['ray'] is samples['sampled_point_ray_direction']
    assert out_fast['dists'] is samples['sampled_point_distance']

    # Fused Pallas copy path: fresh buffers, one launch for all three tensors.
    out = volume_encoder_forward(samples, use_pallas_copy=True)
    out = jax.block_until_ready(out)
    assert out['pos'].shape == (S, N, K, C)
    assert out['ray'].shape == (S, N, K, C)
    assert out['dists'].shape == (S, N, K)
    assert jnp.array_equal(out['pos'], samples['sampled_point_xyz'])
    assert jnp.array_equal(out['ray'], samples['sampled_point_ray_direction'])
    assert jnp.array_equal(out['dists'], samples['sampled_point_distance'])

    # Awkward element counts (not a multiple of 128) exercise the padded
    # lane-dense path: every tensor is still genuinely copied.
    k4, k5, k6 = jax.random.split(jax.random.PRNGKey(1), 3)
    S2, N2, K2 = 1, 5, 7
    samples2 = {
        'sampled_point_xyz':
            jax.random.normal(k4, (S2, N2, K2, C), dtype=jnp.float32),
        'sampled_point_ray_direction':
            jax.random.normal(k5, (S2, N2, K2, C), dtype=jnp.float32),
        'sampled_point_distance':
            jax.random.uniform(k6, (S2, N2, K2), dtype=jnp.float32),
    }
    out2 = volume_encoder_forward(samples2, use_pallas_copy=True)
    out2 = jax.block_until_ready(out2)
    assert jnp.array_equal(out2['pos'], samples2['sampled_point_xyz'])
    assert jnp.array_equal(out2['ray'], samples2['sampled_point_ray_direction'])
    assert jnp.array_equal(out2['dists'], samples2['sampled_point_distance'])

    print("KERNEL_OK")
</pallas_src>

<mosaic_0001>
module attributes {stable_mosaic.version = 11 : i64} {
  func.func @_fused_copy_kernel(%arg0: i32, %arg1: memref<3x1024xf32, #tpu.memory_space<vmem>>, %arg2: memref<3x1024xf32, #tpu.memory_space<vmem>>, %arg3: memref<1x1024xf32, #tpu.memory_space<vmem>>, %arg4: memref<3x1024xf32, #tpu.memory_space<vmem>>, %arg5: memref<3x1024xf32, #tpu.memory_space<vmem>>, %arg6: memref<1x1024xf32, #tpu.memory_space<vmem>>) attributes {dimension_semantics = [#tpu.dimension_semantics<parallel>], iteration_bounds = array<i64: 1>, scalar_prefetch = 0 : i64, scratch_operands = 0 : i64, tpu.core_type = #tpu.core_type<tc>, window_params = [{transform_indices = @transform_0, window_bounds = array<i64: 3, 1024>}, {transform_indices = @transform_1, window_bounds = array<i64: 3, 1024>}, {transform_indices = @transform_2, window_bounds = array<i64: 1, 1024>}, {transform_indices = @transform_3, window_bounds = array<i64: 3, 1024>}, {transform_indices = @transform_4, window_bounds = array<i64: 3, 1024>}, {transform_indices = @transform_5, window_bounds = array<i64: 1, 1024>}]} {
    %c0 = arith.constant 0 : index
    %c0_0 = arith.constant 0 : index
    %0 = vector.load %arg1[%c0, %c0_0] : memref<3x1024xf32, #tpu.memory_space<vmem>>, vector<3x1024xf32>
    %c0_1 = arith.constant 0 : index
    %c0_2 = arith.constant 0 : index
    %1 = vector.load %arg4[%c0_1, %c0_2] : memref<3x1024xf32, #tpu.memory_space<vmem>>, vector<3x1024xf32>
    tpu.vector_store %arg4[%c0_1, %c0_2], %0 {strides = array<i32>} : memref<3x1024xf32, #tpu.memory_space<vmem>>, vector<3x1024xf32>,
    %c0_3 = arith.constant 0 : index
    %c0_4 = arith.constant 0 : index
    %2 = vector.load %arg2[%c0_3, %c0_4] : memref<3x1024xf32, #tpu.memory_space<vmem>>, vector<3x1024xf32>
    %c0_5 = arith.constant 0 : index
    %c0_6 = arith.constant 0 : index
    %3 = vector.load %arg5[%c0_5, %c0_6] : memref<3x1024xf32, #tpu.memory_space<vmem>>, vector<3x1024xf32>
    tpu.vector_store %arg5[%c0_5, %c0_6], %2 {strides = array<i32>} : memref<3x1024xf32, #tpu.memory_space<vmem>>, vector<3x1024xf32>,
    %c0_7 = arith.constant 0 : index
    %c0_8 = arith.constant 0 : index
    %4 = vector.load %arg3[%c0_7, %c0_8] : memref<1x1024xf32, #tpu.memory_space<vmem>>, vector<1x1024xf32>
    %c0_9 = arith.constant 0 : index
    %c0_10 = arith.constant 0 : index
    %5 = vector.load %arg6[%c0_9, %c0_10] : memref<1x1024xf32, #tpu.memory_space<vmem>>, vector<1x1024xf32>
    tpu.vector_store %arg6[%c0_9, %c0_10], %4 {strides = array<i32>} : memref<1x1024xf32, #tpu.memory_space<vmem>>, vector<1x1024xf32>,
    return
  }
  func.func @transform_0(%arg0: i32) -> (i32, i32) {
    %c0_i32 = arith.constant 0 : i32
    %0 = arith.minsi %arg0, %c0_i32 : i32
    %c0_i32_0 = arith.constant 0 : i32
    %c0_i32_1 = arith.constant 0 : i32
    return %0, %c0_i32_0 : i32, i32
  }
  func.func @transform_1(%arg0: i32) -> (i32, i32) {
    %c0_i32 = arith.constant 0 : i32
    %0 = arith.minsi %arg0, %c0_i32 : i32
    %c0_i32_0 = arith.constant 0 : i32
    %c0_i32_1 = arith.constant 0 : i32
    return %0, %c0_i32_0 : i32, i32
  }
  func.func @transform_2(%arg0: i32) -> (i32, i32) {
    %c0_i32 = arith.constant 0 : i32
    %0 = arith.minsi %arg0, %c0_i32 : i32
    %c0_i32_0 = arith.constant 0 : i32
    %c0_i32_1 = arith.constant 0 : i32
    return %0, %c0_i32_0 : i32, i32
  }
  func.func @transform_3(%arg0: i32) -> (i32, i32) {
    %c0_i32 = arith.constant 0 : i32
    %0 = arith.minsi %arg0, %c0_i32 : i32
    %c0_i32_0 = arith.constant 0 : i32
    %c0_i32_1 = arith.constant 0 : i32
    return %0, %c0_i32_0 : i32, i32
  }
  func.func @transform_4(%arg0: i32) -> (i32, i32) {
    %c0_i32 = arith.constant 0 : i32
    %0 = arith.minsi %arg0, %c0_i32 : i32
    %c0_i32_0 = arith.constant 0 : i32
    %c0_i32_1 = arith.constant 0 : i32
    return %0, %c0_i32_0 : i32, i32
  }
  func.func @transform_5(%arg0: i32) -> (i32, i32) {
    %c0_i32 = arith.constant 0 : i32
    %0 = arith.minsi %arg0, %c0_i32 : i32
    %c0_i32_0 = arith.constant 0 : i32
    %c0_i32_1 = arith.constant 0 : i32
    return %0, %c0_i32_0 : i32, i32
  }
}

</mosaic_0001>

<bundles_post_ra>
// kernel: tpu_custom_call.1
= control target key start
LH: loop header
LB: loop body
LE: loop exit
PB: predicated region body
PF: predicated region fallthrough
CT: control target
= control target key end

     0   :  { %11 = vsyncpa [#allocation3], 0  ;;  %s390_s0 = inlined_call_operand.hbm [shape: f32[3,1024], index: 0, kind: input, shape index: {}]   ;;  %s391_s1 = inlined_call_operand.hbm [shape: f32[3,1024], index: 1, kind: input, shape index: {}]   ;;  %s392_s2 = inlined_call_operand.hbm [shape: f32[1,1024], index: 2, kind: input, shape index: {}]   ;;  %s393_s3 = inlined_call_operand.hbm [shape: f32[3,1024], index: 3, kind: output, shape index: {0}]   ;;  %s394_s4 = inlined_call_operand.hbm [shape: f32[3,1024], index: 4, kind: output, shape index: {1}]   ;;  %s395_s5 = inlined_call_operand.hbm [shape: f32[1,1024], index: 5, kind: output, shape index: {2}]  }
   0x1   :  { %12 = vsyncpa [#allocation6], 0 }
   0x2   :  { %13 = vsyncpa [#allocation4], 0 }
   0x3   :  { %14 = vsyncpa [#allocation10], 0  ;;  %s261_s18 = smov [#allocation5]   ;;  %s262_s20 = smov [#allocation2]  }
   0x4   :  { %s31_s19 = sshll.u32 %s261_s18, 4  ;;  %s21_s21 = sshll.u32 %s262_s20, 4  ;;  %s32_s19 = int_to_ptr.vmem [resolvable:$true] %s31_s19  ;;  %s22_s21 = int_to_ptr.vmem [resolvable:$true] %s21_s21 }
   0x5   :  { %s121_s24 = scalar_lea.hbm %s391_s1, 512 }
   0x6   :  { %p122_p0 = scmp.ne.s32.totalorder %s391_s1, %s121_s24  ;;  %p125_p1 = scmp.lt.u32.totalorder %s121_s24, %s391_s1 }
   0x8   :  { %p127_p2 = pnand %p125_p1, %p122_p0 }
   0xa   :  { %130 = shalt.err (!%p127_p2)
}
   0xb   :  { %s131_s29 = scalar_lea.vmem %s32_s19, 512  ;;  %p136_p4 = scmp.lt.s32.totalorder %s32_s19, %s32_s19 }
   0xc   :  { %p132_p3 = scmp.ne.s32.totalorder %s32_s19, %s131_s29  ;;  %p137_p5 = scmp.lt.s32.totalorder %s131_s29, %s131_s29 }
   0xe   :  { %p138_p6 = por %p137_p5, %p136_p4 }
  0x10   :  { %p139_p7 = pnand %p138_p6, %p132_p3 }
  0x12   :  { %142 = shalt.err (!%p139_p7)
}
  0x13   :  { %34 = dma.hbm_to_vmem [thread:$0]  %s391_s1, 512, %s32_s19, [#allocation6]  }
  0x14   :  { %s143_s9 = scalar_lea.hbm %s390_s0, 512 }
  0x15   :  { %p144_p8 = scmp.ne.s32.totalorder %s390_s0, %s143_s9  ;;  %p147_p9 = scmp.lt.u32.totalorder %s143_s9, %s390_s0 }
  0x17   :  { %p149_p10 = pnand %p147_p9, %p144_p8 }
  0x19   :  { %152 = shalt.err (!%p149_p10)
}
  0x1a   :  { %s153_s14 = scalar_lea.vmem %s22_s21, 512  ;;  %p158_p12 = scmp.lt.s32.totalorder %s22_s21, %s22_s21 }
  0x1b   :  { %p154_p11 = scmp.ne.s32.totalorder %s22_s21, %s153_s14  ;;  %p159_p13 = scmp.lt.s32.totalorder %s153_s14, %s153_s14 }
  0x1d   :  { %p160_p0 = por %p159_p13, %p158_p12 }
  0x1f   :  { %p161_p1 = pnand %p160_p0, %p154_p11 }
  0x21   :  { %164 = shalt.err (!%p161_p1)
}
  0x22   :  { %24 = dma.hbm_to_vmem [thread:$0]  %s390_s0, 512, %s22_s21, [#allocation3]  }
  0x23   :  { %s263_s16 = smov [#allocation7]   ;;  %s165_s20 = scalar_lea.hbm %s392_s2, 128 }
  0x24   :  { %s41_s17 = sshll.u32 %s263_s16, 4  ;;  %p166_p2 = scmp.ne.s32.totalorder %s392_s2, %s165_s20  ;;  %s42_s17 = int_to_ptr.vmem [resolvable:$true] %s41_s17 }
  0x25   :  { %p169_p3 = scmp.lt.u32.totalorder %s165_s20, %s392_s2 }
  0x27   :  { %p171_p4 = pnand %p169_p3, %p166_p2 }
  0x29   :  { %174 = shalt.err (!%p171_p4)
}
  0x2a   :  { %s175_s26 = scalar_lea.vmem %s42_s17, 128  ;;  %p180_p6 = scmp.lt.s32.totalorder %s42_s17, %s42_s17 }
  0x2b   :  { %p176_p5 = scmp.ne.s32.totalorder %s42_s17, %s175_s26  ;;  %p181_p7 = scmp.lt.s32.totalorder %s175_s26, %s175_s26 }
  0x2d   :  { %p182_p8 = por %p181_p7, %p180_p6 }
  0x2f   :  { %p183_p9 = pnand %p182_p8, %p176_p5 }
  0x31   :  { %186 = shalt.err (!%p183_p9)
}
  0x32   :  { %44 = dma.hbm_to_vmem [thread:$0]  %s392_s2, 128, %s42_s17, [#allocation6]  }
  0x33   :  { %253 = dma.done.wait [#allocation3], 512  }
  0x34   :  { %254 = vsyncadd [#allocation3], 4294966784 }
  0x35   :  { %255 = dma.done.wait [#allocation6], 640  }
  0x36   :  { %256 = vsyncadd [#allocation6], 4294966656  ;;  %s264_s27 = smov [#allocation9]   ;;  %s265_s29 = smov [#allocation8]   ;;  %v62_v0 = vld [vmem:[#allocation5] sm:$0x77] }
  0x37   :  { %s88_s28 = sshll.u32 %s264_s27, 4  ;;  %s78_s30 = sshll.u32 %s265_s29, 4  ;;  %v63_v1 = vld [vmem:[#allocation5 + $0x8] sm:$0x77]  ;;  %v64_v2 = vld [vmem:[#allocation5 + $0x10] sm:$0x77]  ;;  %s333_s28 = int_to_ptr.vmem [resolvable:$true] %s88_s28  ;;  %s335_s30 = int_to_ptr.vmem [resolvable:$true] %s78_s30 }
  0x38   :  { %s266_s6 = smov [#allocation11]   ;;  %66 = vst [vmem:[#allocation9] sm:$0x77] %v62_v0  ;;  %67 = vst [vmem:[#allocation9 + $0x8] sm:$0x77] %v63_v1  ;;  %v70_v8 = vld [vmem:[#allocation7] sm:$0xff]  ;;  %p192_p11 = scmp.lt.s32.totalorder %s333_s28, %s333_s28 }
  0x39   :  { %s98_s7 = sshll.u32 %s266_s6, 4  ;;  %68 = vst [vmem:[#allocation9 + $0x10] sm:$0x77] %v64_v2  ;;  %v65_v3 = vld [vmem:[#allocation5 + $0x18] sm:$0x77]  ;;  %71 = vst [vmem:[#allocation11] sm:$0xff] %v70_v8  ;;  %s337_s7 = int_to_ptr.vmem [resolvable:$true] %s98_s7 }
  0x3a   :  { %v54_v4 = vld [vmem:[#allocation2] sm:$0x77]  ;;  %v55_v5 = vld [vmem:[#allocation2 + $0x8] sm:$0x77]  ;;  %69 = vst [vmem:[#allocation9 + $0x18] sm:$0x77] %v65_v3 }
  0x3b   :  { %58 = vst [vmem:[#allocation8] sm:$0x77] %v54_v4  ;;  %59 = vst [vmem:[#allocation8 + $0x8] sm:$0x77] %v55_v5  ;;  %v56_v6 = vld [vmem:[#allocation2 + $0x10] sm:$0x77] }
  0x3c   :  { %v57_v7 = vld [vmem:[#allocation2 + $0x18] sm:$0x77]  ;;  %60 = vst [vmem:[#allocation8 + $0x10] sm:$0x77] %v56_v6  ;;  %s187_s2 = scalar_lea.vmem %s333_s28, 512 }
  0x3d   :  { %61 = vst [vmem:[#allocation8 + $0x18] sm:$0x77] %v57_v7  ;;  %p188_p10 = scmp.ne.s32.totalorder %s333_s28, %s187_s2  ;;  %p193_p12 = scmp.lt.s32.totalorder %s187_s2, %s187_s2 }
  0x3f   :  { %p194_p13 = por %p193_p12, %p192_p11 }
  0x41   :  { %p195_p0 = pnand %p194_p13, %p188_p10 }
  0x43   :  { %198 = shalt.err (!%p195_p0)
}
  0x44   :  { %s199_s10 = scalar_lea.hbm %s394_s4, 512 }
  0x45   :  { %p200_p1 = scmp.ne.s32.totalorder %s394_s4, %s199_s10  ;;  %p203_p2 = scmp.lt.u32.totalorder %s199_s10, %s394_s4 }
  0x47   :  { %p205_p3 = pnand %p203_p2, %p200_p1 }
  0x49   :  { %208 = shalt.err (!%p205_p3)
}
  0x4a   :  { %91 = dma.vmem_to_hbm [thread:$0]  %s333_s28, 512, %s394_s4, [#allocation10]  }
  0x4b   :  { %s209_s16 = scalar_lea.vmem %s335_s30, 512  ;;  %p214_p5 = scmp.lt.s32.totalorder %s335_s30, %s335_s30 }
  0x4c   :  { %p210_p4 = scmp.ne.s32.totalorder %s335_s30, %s209_s16  ;;  %p215_p6 = scmp.lt.s32.totalorder %s209_s16, %s209_s16 }
  0x4e   :  { %p216_p7 = por %p215_p6, %p214_p5 }
  0x50   :  { %p217_p8 = pnand %p216_p7, %p210_p4 }
  0x52   :  { %220 = shalt.err (!%p217_p8)
}
  0x53   :  { %s221_s19 = scalar_lea.hbm %s393_s3, 512 }
  0x54   :  { %p222_p9 = scmp.ne.s32.totalorder %s393_s3, %s221_s19  ;;  %p225_p10 = scmp.lt.u32.totalorder %s221_s19, %s393_s3 }
  0x56   :  { %p227_p11 = pnand %p225_p10, %p222_p9 }
  0x58   :  { %230 = shalt.err (!%p227_p11)
}
  0x59   :  { %81 = dma.vmem_to_hbm [thread:$0]  %s335_s30, 512, %s393_s3, [#allocation4]  }
  0x5a   :  { %s231_s26 = scalar_lea.vmem %s337_s7, 128  ;;  %p236_p13 = scmp.lt.s32.totalorder %s337_s7, %s337_s7 }
  0x5b   :  { %p232_p12 = scmp.ne.s32.totalorder %s337_s7, %s231_s26  ;;  %p237_p0 = scmp.lt.s32.totalorder %s231_s26, %s231_s26 }
  0x5d   :  { %p238_p1 = por %p237_p0, %p236_p13 }
  0x5f   :  { %p239_p2 = pnand %p238_p1, %p232_p12 }
  0x61   :  { %242 = shalt.err (!%p239_p2)
}
  0x62   :  { %s243_s27 = scalar_lea.hbm %s395_s5, 128 }
  0x63   :  { %p244_p3 = scmp.ne.s32.totalorder %s395_s5, %s243_s27  ;;  %p247_p4 = scmp.lt.u32.totalorder %s243_s27, %s395_s5 }
  0x65   :  { %p249_p5 = pnand %p247_p4, %p244_p3 }
  0x67   :  { %252 = shalt.err (!%p249_p5)
}
  0x68   :  { %101 = dma.vmem_to_hbm [thread:$0]  %s337_s7, 128, %s395_s5, [#allocation10]  }
  0x69   :  { %257 = dma.done.wait [#allocation4], 512  }
  0x6a   :  { %258 = vsyncadd [#allocation4], 4294966784 }
  0x6b   :  { %259 = dma.done.wait [#allocation10], 640  }
  0x6c   :  { %260 = vsyncadd [#allocation10], 4294966656 }
  0x6d   :  { %111 = vsyncpa [#allocation3], 1 }
  0x6e   :  { %112 = vsyncpa [#allocation6], 1 }
  0x6f   :  { %113 = vsyncpa [#allocation4], 1 }
  0x70   :  { %114 = vsyncpa [#allocation10], 1 }

</bundles_post_ra>
